<compile_context>
chip_gen: v7x
topology: tpu7x:2x2x1
jax: 0.10.0
libtpu: 0.0.40
codegen_flags: <defaults>
</compile_context>

<pallas_src>
import functools

import jax
import jax.numpy as jnp
import numpy as np
from jax.experimental import pallas as pl
from jax.experimental.pallas import tpu as pltpu

EPS = 1e-5                      # PyTorch BatchNorm1d default eps
SELU_ALPHA = 1.6732632423543772
SELU_SCALE = 1.0507009873554805


# ------------------------------ configuration ------------------------------

BATCH = 8

# feature index layout inside the flat input vector (length 95):
#   text[0:20] media[20:40] user_img[40:60] user_des[60:80]
#   numerical[80:90] category[90:93] category_topic[93:95]
N_TEXT, N_MEDIA, N_UIMG, N_UDES = 20, 20, 20, 20
N_READY = N_TEXT + N_MEDIA + N_UIMG + N_UDES           # 80 (one contiguous slice)
N_NUM = 10
N_CAT = 3
N_TOPIC = 2
INPUT_DIM = N_READY + N_NUM + N_CAT + N_TOPIC          # 95

EMB_DIMS = [(10, 4), (8, 4), (6, 8)]                    # (cardinality, emb_dim)
TOPIC_EMB = (60, 12)                                    # topic embedding table
DIM_FLAT_TOPIC = TOPIC_EMB[1] * N_TOPIC                 # 24
NUM_EMBEDS = sum(d for _, d in EMB_DIMS) + DIM_FLAT_TOPIC  # 40

EMBED_LIN_OUT = 64
NUMERIC_LIN_OUT = 64
LAYERS_DIMS = [64, 32, 16]                              # numcat stack (ReLU, ELU, SELU)
READY_DIVISOR = 4
OUT_READY = N_READY // READY_DIVISOR                    # 20
OUT_JOINT = OUT_READY // READY_DIVISOR                  # 5
OUTPUT_DIM = 1

# lane offsets of each embedding block inside the concatenated [.,40] vector
_EMB_WIDTHS = [d for _, d in EMB_DIMS] + [TOPIC_EMB[1], TOPIC_EMB[1]]   # 4,4,8,12,12
_EMB_OFFSETS = list(np.cumsum([0] + _EMB_WIDTHS))                        # 0,4,8,16,28,40


# ------------------------------ activations --------------------------------

def _relu(y):
    return jnp.maximum(y, 0.0)


def _elu(y):
    # PyTorch ELU(alpha=1).  exp(y)-1 instead of expm1 for Mosaic-lowering
    # safety; abs difference is <1e-7 for f32 and inside validation tolerance.
    return jnp.where(y > 0.0, y, jnp.exp(y) - 1.0)


def _selu(y):
    return SELU_SCALE * jnp.where(y > 0.0, y, SELU_ALPHA * (jnp.exp(y) - 1.0))


# ------------------------------ fused kernel -------------------------------

def _fused_forward_kernel(
    x_ref,                                   # [B, 95]  raw input (ids stored as floats)
    m0_ref, m1_ref, m2_ref, m3_ref, m4_ref,  # emb_table_i @ We_slice_i  -> [card_i, 64]
    be_ref,                                  # embedding_linear bias      [1, 64]
    wn_ref, bn_ref,                          # numeric_linear             [10,64],[1,64]
    wr_ref, br_ref,                          # ready Linear+BN folded     [80,20],[1,20]
    w1a_ref, w1b_ref, b1_ref,                # numcat L1 folded, split    [64,64],[64,64],[1,64]
    w2_ref, b2_ref,                          # numcat L2 folded           [64,32],[1,32]
    w3_ref, b3_ref,                          # numcat L3 folded           [32,16],[1,16]
    wja_ref, wjb_ref, bj_ref,                # joint folded, split        [16,5],[20,5],[1,5]
    wh_ref, bh_ref,                          # head folded                [5,1],[1,1]
    o_ref,                                   # [B, 1]
):
    f32 = jnp.float32
    xv = x_ref[...]                          # whole input tile, stays in vregs
    bsz = xv.shape[0]

    x_ready = xv[:, :N_READY]                           # [B, 80]
    x_num = xv[:, N_READY:N_READY + N_NUM]              # [B, 10]
    ids = xv[:, N_READY + N_NUM:].astype(jnp.int32)     # [B, 5] = 3 cat + 2 topic ids

    def emb_select(col, folded_table):
        # one-hot(id) @ (emb_table @ We_slice): exact embedding-row select on MXU
        card = folded_table.shape[0]
        onehot = (jax.lax.broadcasted_iota(jnp.int32, (bsz, card), 1)
                  == ids[:, col:col + 1]).astype(f32)
        return jnp.dot(onehot, folded_table, preferred_element_type=f32)

    # --- embedding branch: concat(embeds) -> Linear(40->64) -> (dropout=id) -> ELU
    h_emb = be_ref[...]
    for col, m_ref in enumerate((m0_ref, m1_ref, m2_ref, m3_ref, m4_ref)):
        h_emb = h_emb + emb_select(col, m_ref[...])
    h_emb = _elu(h_emb)                                                   # [B, 64]

    # --- numeric branch: Linear(10->64) -> (dropout=id) -> ReLU
    h_num = _relu(jnp.dot(x_num, wn_ref[...], preferred_element_type=f32)
                  + bn_ref[...])                                          # [B, 64]

    # --- ready branch: Linear(80->20) + BN (folded) -> (dropout=id) -> ReLU
    h_ready = _relu(jnp.dot(x_ready, wr_ref[...], preferred_element_type=f32)
                    + br_ref[...])                                        # [B, 20]

    # --- numcat stack on concat([h_num, h_emb]); concat done as block-split matmul
    h = (jnp.dot(h_num, w1a_ref[...], preferred_element_type=f32)
         + jnp.dot(h_emb, w1b_ref[...], preferred_element_type=f32)
         + b1_ref[...])
    h = _relu(h)                                                          # [B, 64]
    h = _elu(jnp.dot(h, w2_ref[...], preferred_element_type=f32) + b2_ref[...])   # [B, 32]
    h = _selu(jnp.dot(h, w3_ref[...], preferred_element_type=f32) + b3_ref[...])  # [B, 16]

    # --- joint block on concat([h, h_ready]); again block-split matmul
    hj = (jnp.dot(h, wja_ref[...], preferred_element_type=f32)
          + jnp.dot(h_ready, wjb_ref[...], preferred_element_type=f32)
          + bj_ref[...])
    hj = _relu(hj)                                                        # [B, 5]

    # --- head: Linear(5->1) + BN (folded) -> (dropout=id) -> ELU
    o_ref[...] = _elu(jnp.dot(hj, wh_ref[...], preferred_element_type=f32)
                      + bh_ref[...])                                      # [B, 1]


def forward_fused_impl(x, fused_params):
    n_in = 1 + len(fused_params)
    return pl.pallas_call(
        _fused_forward_kernel,
        out_shape=jax.ShapeDtypeStruct((x.shape[0], OUTPUT_DIM), jnp.float32),
        in_specs=[pl.BlockSpec(memory_space=pltpu.MemorySpace.VMEM)] * n_in,
        out_specs=pl.BlockSpec(memory_space=pltpu.MemorySpace.VMEM),
    )(x, *fused_params)


forward_fused = jax.jit(forward_fused_impl)


# --------------------------- parameter generation --------------------------

def _linear_params(key, din, dout):
    kw, kb = jax.random.split(key)
    bound = 1.0 / np.sqrt(din)
    w = jax.random.uniform(kw, (din, dout), jnp.float32, -bound, bound)
    b = jax.random.uniform(kb, (1, dout), jnp.float32, -bound, bound)
    return w, b


def _bn_params(key, dout):
    k1, k2, k3, k4 = jax.random.split(key, 4)
    gamma = jax.random.uniform(k1, (1, dout), jnp.float32, 0.5, 1.5)
    beta = 0.1 * jax.random.normal(k2, (1, dout), jnp.float32)
    mean = 0.1 * jax.random.normal(k3, (1, dout), jnp.float32)
    var = jax.random.uniform(k4, (1, dout), jnp.float32, 0.5, 1.5)
    return gamma, beta, mean, var


def init_params(key):
    keys = jax.random.split(key, 32)
    ki = iter(keys)
    p = {}
    p["emb_tables"] = [
        0.1 * jax.random.normal(next(ki), (card, dim), jnp.float32)
        for card, dim in EMB_DIMS
    ]
    p["emb_topic"] = 0.1 * jax.random.normal(next(ki), TOPIC_EMB, jnp.float32)

    p["embedding_linear"] = _linear_params(next(ki), NUM_EMBEDS, EMBED_LIN_OUT)
    p["numeric_linear"] = _linear_params(next(ki), N_NUM, NUMERIC_LIN_OUT)

    p["ready_lin"] = _linear_params(next(ki), N_READY, OUT_READY)
    p["ready_bn"] = _bn_params(next(ki), OUT_READY)

    in_dims = [EMBED_LIN_OUT + NUMERIC_LIN_OUT] + LAYERS_DIMS[:-1]
    p["numcat"] = []
    for din, dout in zip(in_dims, LAYERS_DIMS):
        lin = _linear_params(next(ki), din, dout)
        bn = _bn_params(next(ki), dout)
        p["numcat"].append((lin, bn))

    p["joint_lin"] = _linear_params(next(ki), LAYERS_DIMS[-1] + OUT_READY, OUT_JOINT)
    p["joint_bn"] = _bn_params(next(ki), OUT_JOINT)

    p["head_lin"] = _linear_params(next(ki), OUT_JOINT, OUTPUT_DIM)
    p["head_bn"] = _bn_params(next(ki), OUTPUT_DIM)
    return p


# ----------------------- host-side parameter fusion ------------------------

def _fold_bn(lin, bn):
    """Fold eval-mode BatchNorm1d into the preceding Linear."""
    w, b = lin
    gamma, beta, mean, var = bn
    scale = gamma * jax.lax.rsqrt(var + EPS)        # [1, dout]
    return w * scale, (b - mean) * scale + beta


def prepare_fused_params(p):
    """One-time host-side prep: BN folding, embedding-table folding, weight splits."""
    we, be = p["embedding_linear"]
    t0, t1, t2 = p["emb_tables"]
    ttop = p["emb_topic"]
    o = _EMB_OFFSETS
    # concat(e0..e4) @ We  ==  sum_i onehot_i @ (table_i @ We[off_i:off_i+d_i])
    m0 = t0 @ we[o[0]:o[1]]
    m1 = t1 @ we[o[1]:o[2]]
    m2 = t2 @ we[o[2]:o[3]]
    m3 = ttop @ we[o[3]:o[4]]
    m4 = ttop @ we[o[4]:o[5]]

    wn, bn_ = p["numeric_linear"]
    wr, br = _fold_bn(p["ready_lin"], p["ready_bn"])

    (l1, b1n), (l2, b2n), (l3, b3n) = p["numcat"]
    w1, b1 = _fold_bn(l1, b1n)
    w2, b2 = _fold_bn(l2, b2n)
    w3, b3 = _fold_bn(l3, b3n)
    w1a, w1b = w1[:NUMERIC_LIN_OUT], w1[NUMERIC_LIN_OUT:]     # [num | emb] split

    wj, bj = _fold_bn(p["joint_lin"], p["joint_bn"])
    wja, wjb = wj[:LAYERS_DIMS[-1]], wj[LAYERS_DIMS[-1]:]     # [numcat | ready] split

    wh, bh = _fold_bn(p["head_lin"], p["head_bn"])

    return (m0, m1, m2, m3, m4, be,
            wn, bn_,
            wr, br,
            w1a, w1b, b1,
            w2, b2,
            w3, b3,
            wja, wjb, bj,
            wh, bh)


# --------------------------- pure-JAX reference -----------------------------

def forward_reference(x, p):
    """Unfused, unfolded eval-mode forward — mirrors the PyTorch module."""
    bs = x.shape[0]
    x_ready = x[:, :N_READY]
    x_num = x[:, N_READY:N_READY + N_NUM]
    ids = x[:, N_READY + N_NUM:].astype(jnp.int32)

    def bn_eval(y, bn):
        g, be, m, v = bn
        return (y - m) * g / jnp.sqrt(v + EPS) + be

    e = [jnp.take(p["emb_tables"][i], ids[:, i], axis=0) for i in range(N_CAT)]
    topic = jnp.take(p["emb_topic"], ids[:, N_CAT:], axis=0).reshape(bs, DIM_FLAT_TOPIC)
    emb_cat = jnp.concatenate(e + [topic], axis=1)                       # [bs, 40]

    we, be_ = p["embedding_linear"]
    h_emb = _elu(emb_cat @ we + be_)
    wn, bn_ = p["numeric_linear"]
    h_num = _relu(x_num @ wn + bn_)

    wr, br = p["ready_lin"]
    h_ready = _relu(bn_eval(x_ready @ wr + br, p["ready_bn"]))

    h = jnp.concatenate([h_num, h_emb], axis=1)
    for (lin, bn), act in zip(p["numcat"], (_relu, _elu, _selu)):
        w, b = lin
        h = act(bn_eval(h @ w + b, bn))

    wj, bj = p["joint_lin"]
    h = _relu(bn_eval(jnp.concatenate([h, h_ready], axis=1) @ wj + bj, p["joint_bn"]))
    wh, bh = p["head_lin"]
    return _elu(bn_eval(h @ wh + bh, p["head_bn"]))


# --------------------------------- driver ----------------------------------

if __name__ == "__main__":
    key = jax.random.PRNGKey(0)
    k_params, k_x, k_cat, k_top = jax.random.split(key, 4)

    params = init_params(k_params)
    fused_params = prepare_fused_params(params)

    # Input: continuous features ~ N(0,1); categorical/topic columns hold valid
    # integer ids stored as floats (the module casts them to long).
    x = jax.random.normal(k_x, (BATCH, INPUT_DIM), jnp.float32)
    cat_keys = jax.random.split(k_cat, N_CAT)
    for j, (card, _) in enumerate(EMB_DIMS):
        ids = jax.random.randint(cat_keys[j], (BATCH,), 0, card)
        x = x.at[:, N_READY + N_NUM + j].set(ids.astype(jnp.float32))
    topic_ids = jax.random.randint(k_top, (BATCH, N_TOPIC), 0, TOPIC_EMB[0])
    x = x.at[:, N_READY + N_NUM + N_CAT:].set(topic_ids.astype(jnp.float32))

    out = forward_fused(x, fused_params)
    jax.block_until_ready(out)
    assert out.shape == (BATCH, OUTPUT_DIM), out.shape

    # Validate the fused/folded kernel against the plain-JAX eval-mode reference.
    ref = forward_reference(x, params)
    np.testing.assert_allclose(np.asarray(out), np.asarray(ref), rtol=1e-2, atol=1e-2)

    print("KERNEL_OK")
</pallas_src>

<mosaic_0001>
module attributes {stable_mosaic.version = 11 : i64} {
  func.func @_fused_forward_kernel(%arg0: memref<8x95xf32, #tpu.memory_space<vmem>>, %arg1: memref<10x64xf32, #tpu.memory_space<vmem>>, %arg2: memref<8x64xf32, #tpu.memory_space<vmem>>, %arg3: memref<6x64xf32, #tpu.memory_space<vmem>>, %arg4: memref<60x64xf32, #tpu.memory_space<vmem>>, %arg5: memref<60x64xf32, #tpu.memory_space<vmem>>, %arg6: memref<1x64xf32, #tpu.memory_space<vmem>>, %arg7: memref<10x64xf32, #tpu.memory_space<vmem>>, %arg8: memref<1x64xf32, #tpu.memory_space<vmem>>, %arg9: memref<80x20xf32, #tpu.memory_space<vmem>>, %arg10: memref<1x20xf32, #tpu.memory_space<vmem>>, %arg11: memref<64x64xf32, #tpu.memory_space<vmem>>, %arg12: memref<64x64xf32, #tpu.memory_space<vmem>>, %arg13: memref<1x64xf32, #tpu.memory_space<vmem>>, %arg14: memref<64x32xf32, #tpu.memory_space<vmem>>, %arg15: memref<1x32xf32, #tpu.memory_space<vmem>>, %arg16: memref<32x16xf32, #tpu.memory_space<vmem>>, %arg17: memref<1x16xf32, #tpu.memory_space<vmem>>, %arg18: memref<16x5xf32, #tpu.memory_space<vmem>>, %arg19: memref<20x5xf32, #tpu.memory_space<vmem>>, %arg20: memref<1x5xf32, #tpu.memory_space<vmem>>, %arg21: memref<5x1xf32, #tpu.memory_space<vmem>>, %arg22: memref<1x1xf32, #tpu.memory_space<vmem>>, %arg23: memref<8x1xf32, #tpu.memory_space<vmem>>) attributes {dimension_semantics = [], scalar_prefetch = 0 : i64, scratch_operands = 0 : i64, tpu.core_type = #tpu.core_type<tc>} {
    %c0 = arith.constant 0 : index
    %c0_0 = arith.constant 0 : index
    %0 = vector.load %arg0[%c0, %c0_0] : memref<8x95xf32, #tpu.memory_space<vmem>>, vector<8x95xf32>
    %1 = vector.extract_strided_slice %0 {offsets = [0, 0], sizes = [8, 80], strides = [1, 1]} : vector<8x95xf32> to vector<8x80xf32>
    %2 = vector.extract_strided_slice %0 {offsets = [0, 80], sizes = [8, 10], strides = [1, 1]} : vector<8x95xf32> to vector<8x10xf32>
    %3 = vector.extract_strided_slice %0 {offsets = [0, 90], sizes = [8, 5], strides = [1, 1]} : vector<8x95xf32> to vector<8x5xf32>
    %4 = arith.fptosi %3 : vector<8x5xf32> to vector<8x5xi32>
    %c0_1 = arith.constant 0 : index
    %c0_2 = arith.constant 0 : index
    %5 = vector.load %arg6[%c0_1, %c0_2] : memref<1x64xf32, #tpu.memory_space<vmem>>, vector<1x64xf32>
    %c0_3 = arith.constant 0 : index
    %c0_4 = arith.constant 0 : index
    %6 = vector.load %arg1[%c0_3, %c0_4] : memref<10x64xf32, #tpu.memory_space<vmem>>, vector<10x64xf32>
    %7 = tpu.iota {dimensions = array<i32: 1>} : vector<8x10xi32>
    %8 = vector.extract_strided_slice %4 {offsets = [0, 0], sizes = [8, 1], strides = [1, 1]} : vector<8x5xi32> to vector<8x1xi32>
    %9 = vector.broadcast %8 : vector<8x1xi32> to vector<8x10xi32>
    %10 = arith.cmpi eq, %7, %9 : vector<8x10xi32>
    %11 = arith.extui %10 : vector<8x10xi1> to vector<8x10xi32>
    %12 = arith.sitofp %11 : vector<8x10xi32> to vector<8x10xf32>
    %cst = arith.constant dense<0.000000e+00> : vector<8x64xf32>
    %13 = tpu.matmul %12, %6, %cst {dimension_numbers = #tpu.dot_dimension_numbers<[1], [0], [0], [1], [0, 0, 1, 1], [], []>} : vector<8x10xf32>, vector<10x64xf32>, vector<8x64xf32> -> vector<8x64xf32>
    %14 = vector.broadcast %5 : vector<1x64xf32> to vector<8x64xf32>
    %15 = arith.addf %14, %13 : vector<8x64xf32>
    %c0_5 = arith.constant 0 : index
    %c0_6 = arith.constant 0 : index
    %16 = vector.load %arg2[%c0_5, %c0_6] : memref<8x64xf32, #tpu.memory_space<vmem>>, vector<8x64xf32>
    %17 = tpu.iota {dimensions = array<i32: 1>} : vector<8x8xi32>
    %18 = vector.extract_strided_slice %4 {offsets = [0, 1], sizes = [8, 1], strides = [1, 1]} : vector<8x5xi32> to vector<8x1xi32>
    %19 = vector.broadcast %18 : vector<8x1xi32> to vector<8x8xi32>
    %20 = arith.cmpi eq, %17, %19 : vector<8x8xi32>
    %21 = arith.extui %20 : vector<8x8xi1> to vector<8x8xi32>
    %22 = arith.sitofp %21 : vector<8x8xi32> to vector<8x8xf32>
    %cst_7 = arith.constant dense<0.000000e+00> : vector<8x64xf32>
    %23 = tpu.matmul %22, %16, %cst_7 {dimension_numbers = #tpu.dot_dimension_numbers<[1], [0], [0], [1], [0, 0, 1, 1], [], []>} : vector<8x8xf32>, vector<8x64xf32>, vector<8x64xf32> -> vector<8x64xf32>
    %24 = arith.addf %15, %23 : vector<8x64xf32>
    %c0_8 = arith.constant 0 : index
    %c0_9 = arith.constant 0 : index
    %25 = vector.load %arg3[%c0_8, %c0_9] : memref<6x64xf32, #tpu.memory_space<vmem>>, vector<6x64xf32>
    %26 = tpu.iota {dimensions = array<i32: 1>} : vector<8x6xi32>
    %27 = vector.extract_strided_slice %4 {offsets = [0, 2], sizes = [8, 1], strides = [1, 1]} : vector<8x5xi32> to vector<8x1xi32>
    %28 = vector.broadcast %27 : vector<8x1xi32> to vector<8x6xi32>
    %29 = arith.cmpi eq, %26, %28 : vector<8x6xi32>
    %30 = arith.extui %29 : vector<8x6xi1> to vector<8x6xi32>
    %31 = arith.sitofp %30 : vector<8x6xi32> to vector<8x6xf32>
    %cst_10 = arith.constant dense<0.000000e+00> : vector<8x64xf32>
    %32 = tpu.matmul %31, %25, %cst_10 {dimension_numbers = #tpu.dot_dimension_numbers<[1], [0], [0], [1], [0, 0, 1, 1], [], []>} : vector<8x6xf32>, vector<6x64xf32>, vector<8x64xf32> -> vector<8x64xf32>
    %33 = arith.addf %24, %32 : vector<8x64xf32>
    %c0_11 = arith.constant 0 : index
    %c0_12 = arith.constant 0 : index
    %34 = vector.load %arg4[%c0_11, %c0_12] : memref<60x64xf32, #tpu.memory_space<vmem>>, vector<60x64xf32>
    %35 = tpu.iota {dimensions = array<i32: 1>} : vector<8x60xi32>
    %36 = vector.extract_strided_slice %4 {offsets = [0, 3], sizes = [8, 1], strides = [1, 1]} : vector<8x5xi32> to vector<8x1xi32>
    %37 = vector.broadcast %36 : vector<8x1xi32> to vector<8x60xi32>
    %38 = arith.cmpi eq, %35, %37 : vector<8x60xi32>
    %39 = arith.extui %38 : vector<8x60xi1> to vector<8x60xi32>
    %40 = arith.sitofp %39 : vector<8x60xi32> to vector<8x60xf32>
    %cst_13 = arith.constant dense<0.000000e+00> : vector<8x64xf32>
    %41 = tpu.matmul %40, %34, %cst_13 {dimension_numbers = #tpu.dot_dimension_numbers<[1], [0], [0], [1], [0, 0, 1, 1], [], []>} : vector<8x60xf32>, vector<60x64xf32>, vector<8x64xf32> -> vector<8x64xf32>
    %42 = arith.addf %33, %41 : vector<8x64xf32>
    %c0_14 = arith.constant 0 : index
    %c0_15 = arith.constant 0 : index
    %43 = vector.load %arg5[%c0_14, %c0_15] : memref<60x64xf32, #tpu.memory_space<vmem>>, vector<60x64xf32>
    %44 = tpu.iota {dimensions = array<i32: 1>} : vector<8x60xi32>
    %45 = vector.extract_strided_slice %4 {offsets = [0, 4], sizes = [8, 1], strides = [1, 1]} : vector<8x5xi32> to vector<8x1xi32>
    %46 = vector.broadcast %45 : vector<8x1xi32> to vector<8x60xi32>
    %47 = arith.cmpi eq, %44, %46 : vector<8x60xi32>
    %48 = arith.extui %47 : vector<8x60xi1> to vector<8x60xi32>
    %49 = arith.sitofp %48 : vector<8x60xi32> to vector<8x60xf32>
    %cst_16 = arith.constant dense<0.000000e+00> : vector<8x64xf32>
    %50 = tpu.matmul %49, %43, %cst_16 {dimension_numbers = #tpu.dot_dimension_numbers<[1], [0], [0], [1], [0, 0, 1, 1], [], []>} : vector<8x60xf32>, vector<60x64xf32>, vector<8x64xf32> -> vector<8x64xf32>
    %51 = arith.addf %42, %50 : vector<8x64xf32>
    %cst_17 = arith.constant 0.000000e+00 : f32
    %52 = vector.broadcast %cst_17 : f32 to vector<8x64xf32>
    %53 = arith.cmpf ogt, %51, %52 : vector<8x64xf32>
    %54 = math.exp %51 : vector<8x64xf32>
    %cst_18 = arith.constant 1.000000e+00 : f32
    %55 = vector.broadcast %cst_18 : f32 to vector<8x64xf32>
    %56 = arith.subf %54, %55 : vector<8x64xf32>
    %57 = arith.select %53, %51, %56 : vector<8x64xi1>, vector<8x64xf32>
    %c0_19 = arith.constant 0 : index
    %c0_20 = arith.constant 0 : index
    %58 = vector.load %arg7[%c0_19, %c0_20] : memref<10x64xf32, #tpu.memory_space<vmem>>, vector<10x64xf32>
    %cst_21 = arith.constant dense<0.000000e+00> : vector<8x64xf32>
    %59 = tpu.matmul %2, %58, %cst_21 {dimension_numbers = #tpu.dot_dimension_numbers<[1], [0], [0], [1], [0, 0, 1, 1], [], []>} : vector<8x10xf32>, vector<10x64xf32>, vector<8x64xf32> -> vector<8x64xf32>
    %c0_22 = arith.constant 0 : index
    %c0_23 = arith.constant 0 : index
    %60 = vector.load %arg8[%c0_22, %c0_23] : memref<1x64xf32, #tpu.memory_space<vmem>>, vector<1x64xf32>
    %61 = vector.broadcast %60 : vector<1x64xf32> to vector<8x64xf32>
    %62 = arith.addf %59, %61 : vector<8x64xf32>
    %cst_24 = arith.constant 0.000000e+00 : f32
    %63 = vector.broadcast %cst_24 : f32 to vector<8x64xf32>
    %64 = arith.maximumf %62, %63 : vector<8x64xf32>
    %c0_25 = arith.constant 0 : index
    %c0_26 = arith.constant 0 : index
    %65 = vector.load %arg9[%c0_25, %c0_26] : memref<80x20xf32, #tpu.memory_space<vmem>>, vector<80x20xf32>
    %cst_27 = arith.constant dense<0.000000e+00> : vector<8x20xf32>
    %66 = tpu.matmul %1, %65, %cst_27 {dimension_numbers = #tpu.dot_dimension_numbers<[1], [0], [0], [1], [0, 0, 1, 1], [], []>} : vector<8x80xf32>, vector<80x20xf32>, vector<8x20xf32> -> vector<8x20xf32>
    %c0_28 = arith.constant 0 : index
    %c0_29 = arith.constant 0 : index
    %67 = vector.load %arg10[%c0_28, %c0_29] : memref<1x20xf32, #tpu.memory_space<vmem>>, vector<1x20xf32>
    %68 = vector.broadcast %67 : vector<1x20xf32> to vector<8x20xf32>
    %69 = arith.addf %66, %68 : vector<8x20xf32>
    %cst_30 = arith.constant 0.000000e+00 : f32
    %70 = vector.broadcast %cst_30 : f32 to vector<8x20xf32>
    %71 = arith.maximumf %69, %70 : vector<8x20xf32>
    %c0_31 = arith.constant 0 : index
    %c0_32 = arith.constant 0 : index
    %72 = vector.load %arg11[%c0_31, %c0_32] : memref<64x64xf32, #tpu.memory_space<vmem>>, vector<64x64xf32>
    %cst_33 = arith.constant dense<0.000000e+00> : vector<8x64xf32>
    %73 = tpu.matmul %64, %72, %cst_33 {dimension_numbers = #tpu.dot_dimension_numbers<[1], [0], [0], [1], [0, 0, 1, 1], [], []>} : vector<8x64xf32>, vector<64x64xf32>, vector<8x64xf32> -> vector<8x64xf32>
    %c0_34 = arith.constant 0 : index
    %c0_35 = arith.constant 0 : index
    %74 = vector.load %arg12[%c0_34, %c0_35] : memref<64x64xf32, #tpu.memory_space<vmem>>, vector<64x64xf32>
    %cst_36 = arith.constant dense<0.000000e+00> : vector<8x64xf32>
    %75 = tpu.matmul %57, %74, %cst_36 {dimension_numbers = #tpu.dot_dimension_numbers<[1], [0], [0], [1], [0, 0, 1, 1], [], []>} : vector<8x64xf32>, vector<64x64xf32>, vector<8x64xf32> -> vector<8x64xf32>
    %76 = arith.addf %73, %75 : vector<8x64xf32>
    %c0_37 = arith.constant 0 : index
    %c0_38 = arith.constant 0 : index
    %77 = vector.load %arg13[%c0_37, %c0_38] : memref<1x64xf32, #tpu.memory_space<vmem>>, vector<1x64xf32>
    %78 = vector.broadcast %77 : vector<1x64xf32> to vector<8x64xf32>
    %79 = arith.addf %76, %78 : vector<8x64xf32>
    %cst_39 = arith.constant 0.000000e+00 : f32
    %80 = vector.broadcast %cst_39 : f32 to vector<8x64xf32>
    %81 = arith.maximumf %79, %80 : vector<8x64xf32>
    %c0_40 = arith.constant 0 : index
    %c0_41 = arith.constant 0 : index
    %82 = vector.load %arg14[%c0_40, %c0_41] : memref<64x32xf32, #tpu.memory_space<vmem>>, vector<64x32xf32>
    %cst_42 = arith.constant dense<0.000000e+00> : vector<8x32xf32>
    %83 = tpu.matmul %81, %82, %cst_42 {dimension_numbers = #tpu.dot_dimension_numbers<[1], [0], [0], [1], [0, 0, 1, 1], [], []>} : vector<8x64xf32>, vector<64x32xf32>, vector<8x32xf32> -> vector<8x32xf32>
    %c0_43 = arith.constant 0 : index
    %c0_44 = arith.constant 0 : index
    %84 = vector.load %arg15[%c0_43, %c0_44] : memref<1x32xf32, #tpu.memory_space<vmem>>, vector<1x32xf32>
    %85 = vector.broadcast %84 : vector<1x32xf32> to vector<8x32xf32>
    %86 = arith.addf %83, %85 : vector<8x32xf32>
    %cst_45 = arith.constant 0.000000e+00 : f32
    %87 = vector.broadcast %cst_45 : f32 to vector<8x32xf32>
    %88 = arith.cmpf ogt, %86, %87 : vector<8x32xf32>
    %89 = math.exp %86 : vector<8x32xf32>
    %cst_46 = arith.constant 1.000000e+00 : f32
    %90 = vector.broadcast %cst_46 : f32 to vector<8x32xf32>
    %91 = arith.subf %89, %90 : vector<8x32xf32>
    %92 = arith.select %88, %86, %91 : vector<8x32xi1>, vector<8x32xf32>
    %c0_47 = arith.constant 0 : index
    %c0_48 = arith.constant 0 : index
    %93 = vector.load %arg16[%c0_47, %c0_48] : memref<32x16xf32, #tpu.memory_space<vmem>>, vector<32x16xf32>
    %cst_49 = arith.constant dense<0.000000e+00> : vector<8x16xf32>
    %94 = tpu.matmul %92, %93, %cst_49 {dimension_numbers = #tpu.dot_dimension_numbers<[1], [0], [0], [1], [0, 0, 1, 1], [], []>} : vector<8x32xf32>, vector<32x16xf32>, vector<8x16xf32> -> vector<8x16xf32>
    %c0_50 = arith.constant 0 : index
    %c0_51 = arith.constant 0 : index
    %95 = vector.load %arg17[%c0_50, %c0_51] : memref<1x16xf32, #tpu.memory_space<vmem>>, vector<1x16xf32>
    %96 = vector.broadcast %95 : vector<1x16xf32> to vector<8x16xf32>
    %97 = arith.addf %94, %96 : vector<8x16xf32>
    %cst_52 = arith.constant 0.000000e+00 : f32
    %98 = vector.broadcast %cst_52 : f32 to vector<8x16xf32>
    %99 = arith.cmpf ogt, %97, %98 : vector<8x16xf32>
    %100 = math.exp %97 : vector<8x16xf32>
    %cst_53 = arith.constant 1.000000e+00 : f32
    %101 = vector.broadcast %cst_53 : f32 to vector<8x16xf32>
    %102 = arith.subf %100, %101 : vector<8x16xf32>
    %cst_54 = arith.constant 1.67326319 : f32
    %103 = vector.broadcast %cst_54 : f32 to vector<8x16xf32>
    %104 = arith.mulf %103, %102 : vector<8x16xf32>
    %105 = arith.select %99, %97, %104 : vector<8x16xi1>, vector<8x16xf32>
    %cst_55 = arith.constant 1.05070102 : f32
    %106 = vector.broadcast %cst_55 : f32 to vector<8x16xf32>
    %107 = arith.mulf %106, %105 : vector<8x16xf32>
    %c0_56 = arith.constant 0 : index
    %c0_57 = arith.constant 0 : index
    %108 = vector.load %arg18[%c0_56, %c0_57] : memref<16x5xf32, #tpu.memory_space<vmem>>, vector<16x5xf32>
    %cst_58 = arith.constant dense<0.000000e+00> : vector<8x5xf32>
    %109 = tpu.matmul %107, %108, %cst_58 {dimension_numbers = #tpu.dot_dimension_numbers<[1], [0], [0], [1], [0, 0, 1, 1], [], []>} : vector<8x16xf32>, vector<16x5xf32>, vector<8x5xf32> -> vector<8x5xf32>
    %c0_59 = arith.constant 0 : index
    %c0_60 = arith.constant 0 : index
    %110 = vector.load %arg19[%c0_59, %c0_60] : memref<20x5xf32, #tpu.memory_space<vmem>>, vector<20x5xf32>
    %cst_61 = arith.constant dense<0.000000e+00> : vector<8x5xf32>
    %111 = tpu.matmul %71, %110, %cst_61 {dimension_numbers = #tpu.dot_dimension_numbers<[1], [0], [0], [1], [0, 0, 1, 1], [], []>} : vector<8x20xf32>, vector<20x5xf32>, vector<8x5xf32> -> vector<8x5xf32>
    %112 = arith.addf %109, %111 : vector<8x5xf32>
    %c0_62 = arith.constant 0 : index
    %c0_63 = arith.constant 0 : index
    %113 = vector.load %arg20[%c0_62, %c0_63] : memref<1x5xf32, #tpu.memory_space<vmem>>, vector<1x5xf32>
    %114 = vector.broadcast %113 : vector<1x5xf32> to vector<8x5xf32>
    %115 = arith.addf %112, %114 : vector<8x5xf32>
    %cst_64 = arith.constant 0.000000e+00 : f32
    %116 = vector.broadcast %cst_64 : f32 to vector<8x5xf32>
    %117 = arith.maximumf %115, %116 : vector<8x5xf32>
    %c0_65 = arith.constant 0 : index
    %c0_66 = arith.constant 0 : index
    %118 = vector.load %arg21[%c0_65, %c0_66] : memref<5x1xf32, #tpu.memory_space<vmem>>, vector<5x1xf32>
    %cst_67 = arith.constant dense<0.000000e+00> : vector<8x1xf32>
    %119 = tpu.matmul %117, %118, %cst_67 {dimension_numbers = #tpu.dot_dimension_numbers<[1], [0], [0], [1], [0, 0, 1, 1], [], []>} : vector<8x5xf32>, vector<5x1xf32>, vector<8x1xf32> -> vector<8x1xf32>
    %c0_68 = arith.constant 0 : index
    %c0_69 = arith.constant 0 : index
    %120 = vector.load %arg22[%c0_68, %c0_69] : memref<1x1xf32, #tpu.memory_space<vmem>>, vector<1x1xf32>
    %121 = vector.broadcast %120 : vector<1x1xf32> to vector<8x1xf32>
    %122 = arith.addf %119, %121 : vector<8x1xf32>
    %cst_70 = arith.constant 0.000000e+00 : f32
    %123 = vector.broadcast %cst_70 : f32 to vector<8x1xf32>
    %124 = arith.cmpf ogt, %122, %123 : vector<8x1xf32>
    %125 = math.exp %122 : vector<8x1xf32>
    %cst_71 = arith.constant 1.000000e+00 : f32
    %126 = vector.broadcast %cst_71 : f32 to vector<8x1xf32>
    %127 = arith.subf %125, %126 : vector<8x1xf32>
    %128 = arith.select %124, %122, %127 : vector<8x1xi1>, vector<8x1xf32>
    %c0_72 = arith.constant 0 : index
    %c0_73 = arith.constant 0 : index
    %129 = vector.load %arg23[%c0_72, %c0_73] : memref<8x1xf32, #tpu.memory_space<vmem>>, vector<8x1xf32>
    tpu.vector_store %arg23[%c0_72, %c0_73], %128 {strides = array<i32>} : memref<8x1xf32, #tpu.memory_space<vmem>>, vector<8x1xf32>,
    return
  }
}

</mosaic_0001>

<bundles_post_ra>
// kernel: forward_fused_impl.1
= control target key start
LH: loop header
LB: loop body
LE: loop exit
PB: predicated region body
PF: predicated region fallthrough
CT: control target
= control target key end

     0   :  { %s2458_s0 = inlined_call_operand.hbm [shape: f32[8,95], index: 0, kind: input, shape index: {}]   ;;  %s2459_s1 = inlined_call_operand.hbm [shape: f32[10,64], index: 1, kind: input, shape index: {}]   ;;  %s2460_s2 = inlined_call_operand.hbm [shape: f32[8,64], index: 2, kind: input, shape index: {}]   ;;  %s2461_s3 = inlined_call_operand.hbm [shape: f32[6,64], index: 3, kind: input, shape index: {}]   ;;  %s2462_s4 = inlined_call_operand.vmem [shape: f32[60,64], index: 4, kind: input, shape index: {}]   ;;  %s2463_s5 = inlined_call_operand.vmem [shape: f32[60,64], index: 5, kind: input, shape index: {}]   ;;  %s2464_s6 = inlined_call_operand.vmem [shape: f32[1,64], index: 6, kind: input, shape index: {}]   ;;  %s2465_s7 = inlined_call_operand.hbm [shape: f32[10,64], index: 7, kind: input, shape index: {}]   ;;  %s2466_s8 = inlined_call_operand.vmem [shape: f32[1,64], index: 8, kind: input, shape index: {}]   ;;  %s2467_s9 = inlined_call_operand.vmem [shape: f32[80,20], index: 9, kind: input, shape index: {}]   ;;  %s2468_s10 = inlined_call_operand.vmem [shape: f32[1,20], index: 10, kind: input, shape index: {}]   ;;  %s2469_s11 = inlined_call_operand.vmem [shape: f32[64,64], index: 11, kind: input, shape index: {}]   ;;  %s2470_s12 = inlined_call_operand.vmem [shape: f32[64,64], index: 12, kind: input, shape index: {}]   ;;  %s2471_s13 = inlined_call_operand.vmem [shape: f32[1,64], index: 13, kind: input, shape index: {}]   ;;  %s2472_s14 = inlined_call_operand.vmem [shape: f32[64,32], index: 14, kind: input, shape index: {}]   ;;  %s2473_s15 = inlined_call_operand.vmem [shape: f32[1,32], index: 15, kind: input, shape index: {}]   ;;  %s2474_s16 = inlined_call_operand.vmem [shape: f32[32,16], index: 16, kind: input, shape index: {}]   ;;  %s2475_s17 = inlined_call_operand.vmem [shape: f32[1,16], index: 17, kind: input, shape index: {}]   ;;  %s2476_s18 = inlined_call_operand.vmem [shape: f32[16,5], index: 18, kind: input, shape index: {}]   ;;  %s2477_s19 = inlined_call_operand.vmem [shape: f32[20,5], index: 19, kind: input, shape index: {}]   ;;  %s2478_s20 = inlined_call_operand.vmem [shape: f32[1,5], index: 20, kind: input, shape index: {}]   ;;  %s2479_s21 = inlined_call_operand.vmem [shape: f32[5,1], index: 21, kind: input, shape index: {}]   ;;  %s2480_s22 = inlined_call_operand.<no memory space> [shape: f32[1,1], index: 22, kind: input, shape index: {}]   ;;  %s2481_s23 = inlined_call_operand.vmem [shape: f32[8,1], index: 23, kind: output, shape index: {}]  }
   0x1   :  { %2489 = sst [smem:[#allocation14_spill]] %s2458_s0  ;;  %v28_v0 = vstv %s2480_s22 }
   0x2   :  { %2490 = sst [smem:[#allocation15_spill]] %s2459_s1  ;;  %29 = vst [vmem:[#allocation2] sm:$0x1] %v28_v0 }
   0x3   :  { %2491 = sst [smem:[#allocation16_spill]] %s2460_s2 }
   0x4   :  { %2492 = sst [smem:[#allocation17_spill]] %s2461_s3 }
   0x5   :  { %2493 = sst [smem:[#allocation18_spill]] %s2462_s4 }
   0x6   :  { %2494 = sst [smem:[#allocation19_spill]] %s2463_s5 }
   0x7   :  { %2495 = sst [smem:[#allocation20_spill]] %s2464_s6 }
   0x8   :  { %2496 = sst [smem:[#allocation21_spill]] %s2465_s7 }
   0x9   :  { %2497 = sst [smem:[#allocation22_spill]] %s2478_s20 }
   0xa   :  { %2498 = sst [smem:[#allocation23_spill]] %s2481_s23 }
   0xb   :  { %30 = vsyncpa [#allocation4], 0 }
   0xc   :  { %31 = vsyncpa [#allocation6], 0 }
   0xd   :  { %32 = vsyncpa [#allocation9], 0  ;;  %s1941_s24 = smov [#allocation5]   ;;  %s2499_s26 = sld [smem:[#allocation15_spill]] }
   0xe   :  { %s48_s25 = sshll.u32 %s1941_s24, 4  ;;  %s49_s25 = int_to_ptr.vmem [resolvable:$true] %s48_s25 }
  0x13   :  { %s1825_s2 = scalar_lea.hbm %s2499_s26, 256 }
  0x14   :  { %p1826_p0 = scmp.ne.s32.totalorder %s2499_s26, %s1825_s2  ;;  %p1829_p1 = scmp.lt.u32.totalorder %s1825_s2, %s2499_s26 }
  0x16   :  { %p1831_p2 = pnand %p1829_p1, %p1826_p0 }
  0x18   :  { %1834 = shalt.err (!%p1831_p2)
}
  0x19   :  { %s1835_s22 = scalar_lea.vmem %s49_s25, 256  ;;  %p1840_p4 = scmp.lt.s32.totalorder %s49_s25, %s49_s25 }
  0x1a   :  { %p1836_p3 = scmp.ne.s32.totalorder %s49_s25, %s1835_s22  ;;  %p1841_p5 = scmp.lt.s32.totalorder %s1835_s22, %s1835_s22 }
  0x1c   :  { %p1842_p6 = por %p1841_p5, %p1840_p4 }
  0x1e   :  { %p1843_p7 = pnand %p1842_p6, %p1836_p3 }
  0x20   :  { %1846 = shalt.err (!%p1843_p7)
}
  0x21   :  { %s1942_s29 = smov 128   ;;  %s1943_s3 = smov 8  }
  0x22   :  { %54 = dma.hbm_to_vmem [thread:$0]  %s2499_s26, 256, %s49_s25, [#allocation6], %s1942_s29, %s1942_s29, %s1943_s3  }
  0x23   :  { %s1944_s30 = smov [#allocation8]   ;;  %s1945_s5 = smov [#allocation3]  }
  0x24   :  { %s71_s24 = sshll.u32 %s1944_s30, 4  ;;  %s39_s1 = sshll.u32 %s1945_s5, 4  ;;  %s72_s24 = int_to_ptr.vmem [resolvable:$true] %s71_s24  ;;  %s40_s1 = int_to_ptr.vmem [resolvable:$true] %s39_s1 }
  0x25   :  { %s2500_s27 = sld [smem:[#allocation17_spill]] }
  0x2b   :  { %s1847_s7 = scalar_lea.hbm %s2500_s27, 128 }
  0x2c   :  { %p1848_p8 = scmp.ne.s32.totalorder %s2500_s27, %s1847_s7  ;;  %p1851_p9 = scmp.lt.u32.totalorder %s1847_s7, %s2500_s27 }
  0x2e   :  { %p1853_p10 = pnand %p1851_p9, %p1848_p8 }
  0x30   :  { %1856 = shalt.err (!%p1853_p10)
}
  0x31   :  { %s1857_s25 = scalar_lea.vmem %s72_s24, 128  ;;  %p1862_p12 = scmp.lt.s32.totalorder %s72_s24, %s72_s24 }
  0x32   :  { %p1858_p11 = scmp.ne.s32.totalorder %s72_s24, %s1857_s25  ;;  %p1863_p13 = scmp.lt.s32.totalorder %s1857_s25, %s1857_s25 }
  0x34   :  { %p1864_p0 = por %p1863_p13, %p1862_p12 }
  0x36   :  { %p1865_p1 = pnand %p1864_p0, %p1858_p11 }
  0x38   :  { %1868 = shalt.err (!%p1865_p1)
}
  0x39   :  { %74 = dma.hbm_to_vmem [thread:$0]  %s2500_s27, 128, %s72_s24, [#allocation9]  }
  0x3a   :  { %s2501_s5 = sld [smem:[#allocation14_spill]] }
  0x40   :  { %s1869_s2 = scalar_lea.hbm %s2501_s5, 128 }
  0x41   :  { %p1870_p2 = scmp.ne.s32.totalorder %s2501_s5, %s1869_s2  ;;  %p1873_p3 = scmp.lt.u32.totalorder %s1869_s2, %s2501_s5 }
  0x43   :  { %p1875_p4 = pnand %p1873_p3, %p1870_p2 }
  0x45   :  { %1878 = shalt.err (!%p1875_p4)
}
  0x46   :  { %s1879_s28 = scalar_lea.vmem %s40_s1, 128  ;;  %p1884_p6 = scmp.lt.s32.totalorder %s40_s1, %s40_s1 }
  0x47   :  { %p1880_p5 = scmp.ne.s32.totalorder %s40_s1, %s1879_s28  ;;  %p1885_p7 = scmp.lt.s32.totalorder %s1879_s28, %s1879_s28 }
  0x49   :  { %p1886_p8 = por %p1885_p7, %p1884_p6 }
  0x4b   :  { %p1887_p9 = pnand %p1886_p8, %p1880_p5 }
  0x4d   :  { %1890 = shalt.err (!%p1887_p9)
}
  0x4e   :  { %42 = dma.hbm_to_vmem [thread:$0]  %s2501_s5, 128, %s40_s1, [#allocation4]  }
  0x4f   :  { %s1946_s22 = smov [#allocation7]   ;;  %s1947_s26 = smov [#allocation10]  }
  0x50   :  { %s61_s25 = sshll.u32 %s1946_s22, 4  ;;  %s86_s0 = sshll.u32 %s1947_s26, 4  ;;  %s62_s25 = int_to_ptr.vmem [resolvable:$true] %s61_s25  ;;  %s87_s0 = int_to_ptr.vmem [resolvable:$true] %s86_s0 }
  0x51   :  { %s2502_s2 = sld [smem:[#allocation16_spill]] }
  0x57   :  { %s1891_s20 = scalar_lea.hbm %s2502_s2, 128 }
  0x58   :  { %p1892_p10 = scmp.ne.s32.totalorder %s2502_s2, %s1891_s20  ;;  %p1895_p11 = scmp.lt.u32.totalorder %s1891_s20, %s2502_s2 }
  0x5a   :  { %p1897_p12 = pnand %p1895_p11, %p1892_p10 }
  0x5c   :  { %1900 = shalt.err (!%p1897_p12)
}
  0x5d   :  { %s1901_s1 = scalar_lea.vmem %s62_s25, 128  ;;  %p1906_p0 = scmp.lt.s32.totalorder %s62_s25, %s62_s25 }
  0x5e   :  { %p1902_p13 = scmp.ne.s32.totalorder %s62_s25, %s1901_s1  ;;  %p1907_p1 = scmp.lt.s32.totalorder %s1901_s1, %s1901_s1 }
  0x60   :  { %p1908_p2 = por %p1907_p1, %p1906_p0 }
  0x62   :  { %p1909_p3 = pnand %p1908_p2, %p1902_p13 }
  0x64   :  { %1912 = shalt.err (!%p1909_p3)
}
  0x65   :  { %64 = dma.hbm_to_vmem [thread:$0]  %s2502_s2, 128, %s62_s25, [#allocation6]  }
  0x66   :  { %s2503_s26 = sld [smem:[#allocation21_spill]] }
  0x6c   :  { %s1913_s4 = scalar_lea.hbm %s2503_s26, 256 }
  0x6d   :  { %p1914_p4 = scmp.ne.s32.totalorder %s2503_s26, %s1913_s4  ;;  %p1917_p5 = scmp.lt.u32.totalorder %s1913_s4, %s2503_s26 }
  0x6f   :  { %p1919_p6 = pnand %p1917_p5, %p1914_p4 }
  0x71   :  { %1922 = shalt.err (!%p1919_p6)
}
  0x72   :  { %s1923_s7 = scalar_lea.vmem %s87_s0, 256  ;;  %p1928_p8 = scmp.lt.s32.totalorder %s87_s0, %s87_s0 }
  0x73   :  { %p1924_p7 = scmp.ne.s32.totalorder %s87_s0, %s1923_s7  ;;  %p1929_p9 = scmp.lt.s32.totalorder %s1923_s7, %s1923_s7 }
  0x75   :  { %p1930_p10 = por %p1929_p9, %p1928_p8 }
  0x77   :  { %p1931_p11 = pnand %p1930_p10, %p1924_p7 }
  0x79   :  { %1934 = shalt.err (!%p1931_p11)
}
  0x7a   :  { %92 = dma.hbm_to_vmem [thread:$0]  %s2503_s26, 256, %s87_s0, [#allocation9], %s1942_s29, %s1942_s29, %s1943_s3  }
  0x7b   :  { %1935 = dma.done.wait [#allocation4], 128  }
  0x7c   :  { %1936 = vsyncadd [#allocation4], 4294967168 }
  0x7d   :  { %1937 = dma.done.wait [#allocation6], 384  }
  0x7e   :  { %1938 = vsyncadd [#allocation6], 4294966912 }
  0x7f   :  { %1939 = dma.done.wait [#allocation9], 384  }
  0x80   :  { %1940 = vsyncadd [#allocation9], 4294966912  ;;  %v1948_v1 = vmov 90   ;;  %v1949_v2 = vmov 92   ;;  %v1950_v3 = vmov 0.0|0.0   ;;  %vm155_vm0 = vcmask 1041408  }
  0x81   :  { %1811 = vset.pattern.permute.xlu0 %v1948_v1  ;;  %1813 = vset.pattern.permute.xlu1 %v1949_v2  ;;  %vm1951_vm1 = vmmov 1   ;;  %v2154_v5 = vld [vmem:[#allocation3] sm:$0xff]  ;;  %v141_v6 = vld [vmem:[#allocation5] sm:$0xff]  ;;  %v142_v7 = vld [vmem:[#allocation5 + $0x8] sm:$0x3]  ;;  %v1952_v11 = vmov 0.0   ;;  %v143_v18 = vlaneseq }
  0x82   :  { %1686 = vmatprep.subr.bf16.mxu0 %v1950_v3  ;;  %1716 = vmatprep.subr.bf16.mxu1 %v1950_v3  ;;  %vm2150_vm2 = vmpackc.low %vm155_vm0, %vm1951_vm1  ;;  %v1792_v8 = vtrunc.f32 %v2154_v5  ;;  %v1687_v9 = vpack.c.bf16 %v142_v7, %v141_v6  ;;  %vm1953_vm3 = vmmov 0   ;;  %v1954_v12 = vmov 91   ;;  %s1957_s29 = smov 48   ;;  %v593_v15 = vld [vmem:[#allocation10] sm:$0xff]  ;;  %v594_v16 = vld [vmem:[#allocation10 + $0x8] sm:$0x3] }
  0x83   :  { %1516 = vmatprep.mubr.msk.f32.mxu0 %vm1953_vm3, %v1952_v11  ;;  %1571 = vmatprep.mubr.msk.f32.mxu1 %vm1953_vm3, %v1952_v11  ;;  %v1955_v13 = vmov 93   ;;  %v1956_v14 = vmov 94   ;;  %v1717_v17 = vpack.c.bf16 %v594_v16, %v593_v15  ;;  %v2168_v19 = vand.u32 127, %v143_v18  ;;  %v236_v21 = vld [vmem:[#allocation7] sm:$0xff]  ;;  %v682_v24 = vld [vmem:[%s2467_s9 + $0x8] sm:$0xff]  ;;  %v683_v28 = vld [vmem:[%s2467_s9 + $0x10] sm:$0xff] }
  0x84   :  { %v1793_v10 = vcvt.f32.s32 %v1792_v8  ;;  %1689 = vmatpush3.bf16.msk.msra.mxu0 %vm2150_vm2, %v1687_v9  ;;  %vm151_vm4 = vcmask 80896   ;;  %v681_v23 = vld [vmem:[%s2467_s9] sm:$0xff]  ;;  %vm243_vm7 = vcmask 64512   ;;  %v684_v29 = vld [vmem:[%s2467_s9 + $0x18] sm:$0xff]  ;;  %vm329_vm8 = vcmask 1045504   ;;  %v686_v35 = vld [vmem:[%s2467_s9 + $0x28] sm:$0xff] }
  0x85   :  { %1519 = vmatprep.subr.mxu0 %v1952_v11  ;;  %1719 = vmatpush3.bf16.msk.msra.mxu1 %vm2150_vm2, %v1717_v17  ;;  %v1721_v26 = vpack.c.bf16 %v682_v24, %v681_v23  ;;  %v318_v30 = vld [vmem:[#allocation8] sm:$0x3f]  ;;  %v1724_v33 = vpack.c.bf16 %v684_v29, %v683_v28  ;;  %s2506_s7 = sld [smem:[#allocation18_spill]]  ;;  %vm325_vm10 = vcmask 48128   ;;  %v687_v41 = vld [vmem:[%s2467_s9 + $0x30] sm:$0xff]  ;;  %v688_v42 = vld [vmem:[%s2467_s9 + $0x38] sm:$0xff] }
  0x86   :  { %146 = vperm.xlu0 %1811, %v1793_v10   ;;  %320 = vperm.xlu1 %1813, %v1793_v10   ;;  %v685_v34 = vld [vmem:[%s2467_s9 + $0x20] sm:$0xff]  ;;  %v1730_v45 = vpack.c.bf16 %v688_v42, %v687_v41  ;;  %v690_v48 = vld [vmem:[%s2467_s9 + $0x48] sm:$0xff]  ;;  %vm422_vm11 = vcmask 1043456   ;;  %vm418_vm14 = vcmask 490496   ;;  %vm698_vm0 = vcmask 654336   ;;  %v782_v15 = vld [vmem:[%s2470_s12 + $0x10] sm:$0xff] }
  0x87   :  { %1720 = vmatprep.subr.bf16.mxu1 %v1950_v3  ;;  %v1727_v38 = vpack.c.bf16 %v686_v35, %v685_v34  ;;  %v689_v47 = vld [vmem:[%s2467_s9 + $0x40] sm:$0xff]  ;;  %vm2251_vm12 = vmpackc.low %vm422_vm11, %vm1951_vm1  ;;  %v783_v16 = vld [vmem:[%s2470_s12 + $0x18] sm:$0xff]  ;;  %s2510_s2 = sld [smem:[#allocation20_spill]]  ;;  %vm788_vm1 = vcmask 523264   ;;  %s2511_s4 = sld [smem:[#allocation22_spill]] }
  0x88   :  { %v1733_v51 = vpack.c.bf16 %v690_v48, %v689_v47  ;;  %v1739_v17 = vpack.c.bf16 %v783_v16, %v782_v15  ;;  %v785_v18 = vld [vmem:[%s2470_s12 + $0x28] sm:$0xff]  ;;  %v774_v35 = vld [vmem:[%s2469_s11 + $0x10] sm:$0xff]  ;;  %v1410_v42 = vld [vmem:[%s2466_s8] ss:$0 sm:$0xff]  ;;  %s2512_s20 = sld [smem:[#allocation23_spill]] }
  0x89   :  { %v949_v57 = vld [vmem:[%s2472_s14 + $0x28] sm:$0xff]  ;;  %v1037_v16 = vld [vmem:[%s2474_s16] sm:$0xff] }
  0x8a   :  { %1812 = vset.pattern.permute.xlu0 %v1954_v12  ;;  %1814 = vset.pattern.permute.xlu1 %v1955_v13  ;;  %v780_v12 = vld [vmem:[%s2470_s12] sm:$0xff]  ;;  %v781_v13 = vld [vmem:[%s2470_s12 + $0x8] sm:$0xff] }
  0x8b   :  { %238 = vperm.xlu0 %1812, %v1793_v10   ;;  %413 = vperm.xlu1 %1814, %v1793_v10   ;;  %v404_v36 = vld [vmem:[%s2506_s7] sm:$0xff]  ;;  %v405_v37 = vld [vmem:[%s2506_s7 + $0x8] sm:$0xff]  ;;  %v406_v43 = vld [vmem:[%s2506_s7 + $0x10] sm:$0xff] }
  0x8c   :  { %v1691_v40 = vpack.c.bf16 %v405_v37, %v404_v36  ;;  %v407_v44 = vld [vmem:[%s2506_s7 + $0x18] sm:$0xff]  ;;  %v408_v49 = vld [vmem:[%s2506_s7 + $0x20] sm:$0xff]  ;;  %v409_v50 = vld [vmem:[%s2506_s7 + $0x28] sm:$0xff] }
  0x8d   :  { %v1694_v46 = vpack.c.bf16 %v407_v44, %v406_v43  ;;  %v1697_v52 = vpack.c.bf16 %v409_v50, %v408_v49  ;;  %v410_v53 = vld [vmem:[%s2506_s7 + $0x30] sm:$0xff]  ;;  %v411_v54 = vld [vmem:[%s2506_s7 + $0x38] sm:$0xf]  ;;  %s2509_s7 = sld [smem:[#allocation19_spill]]  ;;  %v944_v50 = vld [vmem:[%s2472_s14] sm:$0xff] }
  0x8e   :  { %v1700_v56 = vpack.c.bf16 %v411_v54, %v410_v53  ;;  %v775_v36 = vld [vmem:[%s2469_s11 + $0x18] sm:$0xff]  ;;  %v778_v43 = vld [vmem:[%s2469_s11 + $0x30] sm:$0xff] }
  0x8f   :  { %1815 = vset.pattern.permute.xlu1 %v1956_v14  ;;  %603 = vrot.lane.b32.xlu0 %v2154_v5, %s1957_s29  ;;  %v779_v44 = vld [vmem:[%s2469_s11 + $0x38] sm:$0xff] }
  0x90   :  { %506 = vperm.xlu1 %1815, %v1793_v10   ;;  %1816 = vset.pattern.permute.xlu0 %v1956_v14  ;;  %v1736_v14 = vpack.c.bf16 %v781_v13, %v780_v12  ;;  %v947_v54 = vld [vmem:[%s2472_s14 + $0x18] sm:$0xff] }
  0x93   :  { %v497_v58 = vld [vmem:[%s2509_s7] sm:$0xff]  ;;  %v498_v59 = vld [vmem:[%s2509_s7 + $0x8] sm:$0xff]  ;;  %v499_v62 = vld [vmem:[%s2509_s7 + $0x10] sm:$0xff] }
  0x94   :  { %v1704_v61 = vpack.c.bf16 %v498_v59, %v497_v58  ;;  %v500_v63 = vld [vmem:[%s2509_s7 + $0x18] sm:$0xff]  ;;  %v501_v1 = vld [vmem:[%s2509_s7 + $0x20] sm:$0xff]  ;;  %v502_v2 = vld [vmem:[%s2509_s7 + $0x28] sm:$0xff] }
  0x95   :  { %v1707_v0 = vpack.c.bf16 %v500_v63, %v499_v62  ;;  %v1710_v4 = vpack.c.bf16 %v502_v2, %v501_v1  ;;  %v503_v6 = vld [vmem:[%s2509_s7 + $0x30] sm:$0xff]  ;;  %v504_v7 = vld [vmem:[%s2509_s7 + $0x38] sm:$0xf]  ;;  %v1417_v1 = vld [vmem:[%s2471_s13] ss:$0 sm:$0xff] }
  0x96   :  { %v1713_v9 = vpack.c.bf16 %v504_v7, %v503_v6  ;;  %v950_v59 = vld [vmem:[%s2472_s14 + $0x30] sm:$0xff]  ;;  %v1131_v6 = vld [vmem:[%s2477_s19] sm:$0xff]  ;;  %v1132_v7 = vld [vmem:[%s2477_s19 + $0x8] sm:$0xff] }
 0x105   :  { %v147_v20 = vpop.permute.xlu0 %146  ;;  %v321_v32 = vpop.permute.xlu1 %320 }
 0x106   :  { %vm148_vm5 = vcmp.eq.s32.totalorder %v2168_v19, %v147_v20  ;;  %vm322_vm9 = vcmp.eq.s32.totalorder %v2168_v19, %v321_v32  ;;  %v786_v20 = vld [vmem:[%s2470_s12 + $0x30] sm:$0xff] }
 0x107   :  { %v1394_v22 = vsel %vm148_vm5, 1.0, %v1952_v11  ;;  %v1400_v39 = vsel %vm322_vm9, 1.0, %v1952_v11  ;;  %vm1048_vm5 = vcmask 261120   ;;  %vm1302_vm9 = vcmask 39936  }
 0x108   :  { %1517 = vmatmul.mubr.msk.f32.vlgmr.msra.gmra.mrb[0].mxu0 %vm151_vm4, %v1394_v22 }
 0x109   :  { %1520 = vmatpush3.msra.mxu0 %v236_v21  ;;  %1521 = vmatprep.mubr.msk.f32.mxu0 %vm1953_vm3, %v1952_v11  ;;  %v787_v21 = vld [vmem:[%s2470_s12 + $0x38] sm:$0xff] }
 0x10a   :  { %v239_v25 = vpop.permute.xlu0 %238  ;;  %1524 = vmatprep.subr.mxu0 %v1952_v11  ;;  %v414_v55 = vpop.permute.xlu1 %413  ;;  %v1745_v22 = vpack.c.bf16 %v787_v21, %v786_v20  ;;  %v1418_v21 = vld [vmem:[%s2473_s15] ss:$0 sm:$0xff] }
 0x10b   :  { %vm240_vm6 = vcmp.eq.s32.totalorder %v2168_v19, %v239_v25  ;;  %vm415_vm13 = vcmp.eq.s32.totalorder %v2168_v19, %v414_v55  ;;  %v1397_v25 = vld [vmem:[%s2510_s2] ss:$0 sm:$0xff] }
 0x10c   :  { %v1398_v27 = vsel %vm240_vm6, 1.0, %v1952_v11  ;;  %v1403_v60 = vsel %vm415_vm13, 1.0, %v1952_v11 }
 0x10e   :  { %v604_v31 = vpop.permute.xlu0 %603 }
 0x10f   :  { %1572 = vmatmul.mubr.msk.f32.vlgmr.msra.gmra.mrb[0].mxu1 %vm151_vm4, %v604_v31  ;;  %v507_v8 = vpop.permute.xlu1 %506  ;;  %v773_v31 = vld [vmem:[%s2469_s11 + $0x8] sm:$0xff]  ;;  %vm1134_vm4 = vcmask 162816  }
 0x110   :  { %1522 = vmatmul.mubr.msk.f32.vlgmr.msra.gmra.mrb[0].mxu0 %vm243_vm7, %v1398_v27  ;;  %1722 = vmatpush3.bf16.msra.mxu1 %v1721_v26  ;;  %vm508_vm15 = vcmp.eq.s32.totalorder %v2168_v19, %v507_v8  ;;  %vm1211_vm7 = vcmask 130048  }
 0x111   :  { %1525 = vmatpush3.msk.msra.mxu0 %vm329_vm8, %v318_v30  ;;  %1526 = vmatprep.mubr.msk.f32.mxu0 %vm1953_vm3, %v1952_v11  ;;  %v1406_v10 = vsel %vm508_vm15, 1.0, %v1952_v11  ;;  %v772_v30 = vld [vmem:[%s2469_s11] sm:$0xff]  ;;  %vm1306_vm8 = vcmask 1044480  }
 0x112   :  { %1690 = vmatprep.subr.bf16.mxu0 %v1950_v3  ;;  %1723 = vmatprep.subr.bf16.mxu1 %v1950_v3  ;;  %v1748_v34 = vpack.c.bf16 %v773_v31, %v772_v30  ;;  %v1130_v31 = vld [vmem:[%s2476_s18 + $0x8] sm:$0xff] }
 0x113   :  { %1594 = vmatprep.mubr.msk.f32.mxu1 %vm1953_vm3, %v1952_v11 }
 0x114   :  { %1725 = vmatpush3.bf16.msra.mxu1 %v1724_v33 }
 0x115   :  { %1726 = vmatprep.subr.bf16.mxu1 %v1950_v3 }
 0x118   :  { %1527 = vmatmul.mubr.msk.f32.vlgmr.msra.gmra.mrb[0].mxu0 %vm325_vm10, %v1400_v39  ;;  %1728 = vmatpush3.bf16.msra.mxu1 %v1727_v38  ;;  %v1751_v38 = vpack.c.bf16 %v775_v36, %v774_v35  ;;  %v776_v39 = vld [vmem:[%s2469_s11 + $0x20] sm:$0xff]  ;;  %vm1385_vm10 = vcmask 7168  }
 0x119   :  { %1692 = vmatpush3.bf16.msra.mxu0 %v1691_v40  ;;  %1545 = vmatprep.mubr.msk.f32.mxu0 %vm1953_vm3, %v1952_v11  ;;  %v777_v40 = vld [vmem:[%s2469_s11 + $0x28] sm:$0xff] }
 0x11a   :  { %1693 = vmatprep.subr.bf16.mxu0 %v1950_v3  ;;  %1729 = vmatprep.subr.bf16.mxu1 %v1950_v3  ;;  %v1754_v41 = vpack.c.bf16 %v777_v40, %v776_v39 }
 0x11c   :  { %1731 = vmatpush3.bf16.msra.mxu1 %v1730_v45 }
 0x11d   :  { %1695 = vmatpush3.bf16.msra.mxu0 %v1694_v46  ;;  %1732 = vmatprep.subr.bf16.mxu1 %v1950_v3  ;;  %v1757_v46 = vpack.c.bf16 %v779_v44, %v778_v43  ;;  %v1427_v44 = vld [vmem:[%s2511_s4] ss:$0 sm:$0xff] }
 0x11e   :  { %1696 = vmatprep.subr.bf16.mxu0 %v1950_v3 }
 0x120   :  { %1734 = vmatpush3.bf16.msra.mxu1 %v1733_v51  ;;  %v945_v51 = vld [vmem:[%s2472_s14 + $0x8] sm:$0xff] }
 0x121   :  { %1698 = vmatpush3.bf16.msra.mxu0 %v1697_v52  ;;  %1735 = vmatprep.subr.bf16.mxu1 %v1950_v3  ;;  %v946_v52 = vld [vmem:[%s2472_s14 + $0x10] sm:$0xff]  ;;  %v1760_v53 = vpack.c.bf16 %v945_v51, %v944_v50 }
 0x122   :  { %1699 = vmatprep.subr.bf16.mxu0 %v1950_v3  ;;  %v1763_v55 = vpack.c.bf16 %v947_v54, %v946_v52 }
 0x123   :  { %1595 = vmatmul.mubr.msk.f32.vlgmr.msra.gmra.mrb[2].mxu1 %vm698_vm0, %v2154_v5  ;;  %v784_v5 = vld [vmem:[%s2470_s12 + $0x20] sm:$0xff] }
 0x124   :  { %1737 = vmatpush3.bf16.msra.mxu1 %v1736_v14  ;;  %1613 = vmatprep.mubr.msk.f32.mxu1 %vm1953_vm3, %v1952_v11  ;;  %v1742_v19 = vpack.c.bf16 %v785_v18, %v784_v5  ;;  %v1133_v14 = vld [vmem:[%s2477_s19 + $0x10] sm:$0xf] }
 0x125   :  { %1702 = vmatpush3.bf16.msk.msra.mxu0 %vm2251_vm12, %v1700_v56  ;;  %1738 = vmatprep.subr.bf16.mxu1 %v1950_v3  ;;  %v948_v56 = vld [vmem:[%s2472_s14 + $0x20] sm:$0xff]  ;;  %v1039_v18 = vld [vmem:[%s2474_s16 + $0x10] sm:$0xff] }
 0x126   :  { %1703 = vmatprep.subr.bf16.mxu0 %v1950_v3  ;;  %v1766_v58 = vpack.c.bf16 %v949_v57, %v948_v56 }
 0x128   :  { %1546 = vmatmul.mubr.msk.f32.vlgmr.msra.gmra.mrb[0].mxu0 %vm418_vm14, %v1403_v60  ;;  %1740 = vmatpush3.bf16.msra.mxu1 %v1739_v17  ;;  %v951_v60 = vld [vmem:[%s2472_s14 + $0x38] sm:$0xff]  ;;  %v1038_v17 = vld [vmem:[%s2474_s16 + $0x8] sm:$0xff] }
 0x129   :  { %1705 = vmatpush3.bf16.msra.mxu0 %v1704_v61  ;;  %1564 = vmatprep.mubr.msk.f32.mxu0 %vm1953_vm3, %v1952_v11  ;;  %v1769_v61 = vpack.c.bf16 %v951_v60, %v950_v59  ;;  %v1772_v5 = vpack.c.bf16 %v1038_v17, %v1037_v16 }
 0x12a   :  { %1706 = vmatprep.subr.bf16.mxu0 %v1950_v3  ;;  %1741 = vmatprep.subr.bf16.mxu1 %v1950_v3 }
 0x12c   :  { %1743 = vmatpush3.bf16.msra.mxu1 %v1742_v19  ;;  %v1040_v19 = vld [vmem:[%s2474_s16 + $0x18] sm:$0xff] }
 0x12d   :  { %1708 = vmatpush3.bf16.msra.mxu0 %v1707_v0  ;;  %1744 = vmatprep.subr.bf16.mxu1 %v1950_v3  ;;  %v1775_v20 = vpack.c.bf16 %v1040_v19, %v1039_v18 }
 0x12e   :  { %1709 = vmatprep.subr.bf16.mxu0 %v1950_v3 }
 0x130   :  { %1746 = vmatpush3.bf16.msra.mxu1 %v1745_v22 }
 0x131   :  { %1711 = vmatpush3.bf16.msra.mxu0 %v1710_v4  ;;  %1747 = vmatprep.subr.bf16.mxu1 %v1950_v3 }
 0x132   :  { %1712 = vmatprep.subr.bf16.mxu0 %v1950_v3 }
 0x135   :  { %1715 = vmatpush3.bf16.msk.msra.mxu0 %vm2251_vm12, %v1713_v9  ;;  %v1413_v9 = vld [vmem:[%s2468_s10] ss:$0 sm:$0xff] }
 0x136   :  { %1759 = vmatprep.subr.bf16.mxu0 %v1950_v3 }
 0x138   :  { %1565 = vmatmul.mubr.msk.f32.vlgmr.msra.gmra.mrb[0].mxu0 %vm418_vm14, %v1406_v10  ;;  %v1778_v10 = vpack.c.bf16 %v1132_v7, %v1131_v6 }
 0x139   :  { %1651 = vmatprep.mubr.msk.f32.mxu0 %vm1953_vm3, %v1952_v11  ;;  %1761 = vmatpush3.bf16.msra.mxu0 %v1760_v53 }
 0x13a   :  { %1762 = vmatprep.subr.bf16.mxu0 %v1950_v3 }
 0x13d   :  { %1764 = vmatpush3.bf16.msra.mxu0 %v1763_v55 }
 0x13e   :  { %1765 = vmatprep.subr.bf16.mxu0 %v1950_v3 }
 0x141   :  { %1767 = vmatpush3.bf16.msra.mxu0 %v1766_v58 }
 0x142   :  { %1768 = vmatprep.subr.bf16.mxu0 %v1950_v3 }
 0x145   :  { %1770 = vmatpush3.bf16.msra.mxu0 %v1769_v61 }
 0x146   :  { %1777 = vmatprep.subr.bf16.mxu0 %v1950_v3 }
 0x1e2   :  { %v676_v23 = vpop.f32.mrb[0].mxu1 }
 0x1e3   :  { %v1573_v24 = vpop.f32.mrb[1].mxu1  ;;  %v677_v45 = vadd.f32 %v1410_v42, %v676_v23  ;;  %v1294_v42 = vld [vmem:[%s2479_s21] sm:$0x1f] }
 0x1e5   :  { %v680_v47 = vmax.f32 %v677_v45, 0.0 }
 0x1f6   :  { %v767_v48 = vpop.f32.mrb[2].mxu1 }
 0x1f7   :  { %v1596_v49 = vpop.f32.mrb[3].mxu1  ;;  %v768_v13 = vadd.f32 %v1413_v9, %v767_v48 }
 0x1f8   :  { %v1428_v49 = vld [vmem:[#allocation2] ss:$0 sm:$0xff] }
 0x1f9   :  { %v771_v15 = vmax.f32 %v768_v13, 0.0 }
 0x20b   :  { %v583_v26 = vpop.f32.mrb[0].mxu0 }
 0x20c   :  { %v1783_v27 = vadd.f32 %v1397_v25, %v583_v26  ;;  %v1566_v28 = vpop.f32.mrb[1].mxu0 }
 0x20e   :  { %v589_v29 = vmul.f32 1.442695, %v1783_v27  ;;  %vm588_vm2 = vcmp.gt.f32.partialorder %v1783_v27, 0.0 }
 0x210   :  { %1817 = vpow2.f32 %v589_v29 }
 0x21a   :  { %v1818_v32 = vpop.eup %1817 }
 0x21b   :  { %v1409_v33 = vadd.f32 -1.0, %v1818_v32 }
 0x21d   :  { %v592_v37 = vsel %vm588_vm2, %v1783_v27, %v1409_v33  ;;  %v1421_v33 = vld [vmem:[%s2475_s17] ss:$0 sm:$0xff] }
 0x21e   :  { %1614 = vmatmul.mubr.msk.f32.vlgmr.msra.gmra.mrb[4].mxu1 %vm788_vm1, %v592_v37 }
 0x21f   :  { %1749 = vmatpush3.bf16.msra.mxu1 %v1748_v34  ;;  %1632 = vmatprep.mubr.msk.f32.mxu1 %vm1953_vm3, %v1952_v11 }
 0x220   :  { %1750 = vmatprep.subr.bf16.mxu1 %v1950_v3 }
 0x223   :  { %1752 = vmatpush3.bf16.msra.mxu1 %v1751_v38 }
 0x224   :  { %1753 = vmatprep.subr.bf16.mxu1 %v1950_v3 }
 0x227   :  { %1755 = vmatpush3.bf16.msra.mxu1 %v1754_v41 }
 0x228   :  { %1756 = vmatprep.subr.bf16.mxu1 %v1950_v3 }
 0x22b   :  { %1758 = vmatpush3.bf16.msra.mxu1 %v1757_v46 }
 0x22c   :  { %1771 = vmatprep.subr.bf16.mxu1 %v1950_v3 }
 0x22e   :  { %1633 = vmatmul.mubr.msk.f32.vlgmr.msra.gmra.mrb[6].mxu1 %vm788_vm1, %v680_v47 }
 0x22f   :  { %1662 = vmatprep.mubr.msk.f32.mxu1 %vm1953_vm3, %v1952_v11  ;;  %1773 = vmatpush3.bf16.msra.mxu1 %v1772_v5 }
 0x230   :  { %1774 = vmatprep.subr.bf16.mxu1 %v1950_v3 }
 0x233   :  { %1776 = vmatpush3.bf16.msra.mxu1 %v1775_v20 }
 0x234   :  { %1780 = vmatprep.subr.bf16.mxu1 %v1950_v3  ;;  %v1129_v3 = vld [vmem:[%s2476_s18] sm:$0xff] }
 0x235   :  { %v1781_v32 = vpack.c.bf16 %v1130_v31, %v1129_v3 }
 0x2f1   :  { %v858_v62 = vpop.f32.mrb[4].mxu1 }
 0x2f2   :  { %v1615_v63 = vpop.f32.mrb[5].mxu1 }
 0x301   :  { %v931_v0 = vpop.f32.mrb[6].mxu1 }
 0x302   :  { %v932_v2 = vadd.f32 %v931_v0, %v858_v62  ;;  %v1634_v4 = vpop.f32.mrb[7].mxu1 }
 0x304   :  { %v942_v8 = vadd.f32 %v1417_v1, %v932_v2 }
 0x306   :  { %v943_v12 = vmax.f32 %v942_v8, 0.0 }
 0x308   :  { %1652 = vmatmul.mubr.msk.f32.vlgmr.msra.gmra.mrb[2].mxu0 %vm788_vm1, %v943_v12 }
 0x309   :  { %1779 = vmatpush3.bf16.msra.mxu0 %v1778_v10  ;;  %1671 = vmatprep.mubr.msk.f32.mxu0 %vm1953_vm3, %v1952_v11 }
 0x30a   :  { %1669 = vmatprep.subr.mxu0 %v1952_v11 }
 0x30d   :  { %1670 = vmatpush3.msk.msra.mxu0 %vm422_vm11, %v1133_v14 }
 0x30e   :  { %1672 = vmatmul.mubr.msk.f32.vlgmr.msra.gmra.mrb[4].mxu0 %vm1134_vm4, %v771_v15  ;;  %1681 = vmatprep.subr.mxu0 %v1952_v11 }
 0x30f   :  { %1683 = vmatprep.mubr.msk.f32.mxu0 %vm1953_vm3, %v1952_v11  ;;  %1682 = vmatpush3.msk.msra.mxu0 %vm1306_vm8, %v1294_v42 }
 0x3db   :  { %v1028_v22 = vpop.f32.mrb[2].mxu0 }
 0x3dc   :  { %v1029_v23 = vadd.f32 %v1418_v21, %v1028_v22  ;;  %v1653_v24 = vpop.f32.mrb[3].mxu0 }
 0x3de   :  { %v1033_v25 = vmul.f32 1.442695, %v1029_v23  ;;  %vm1032_vm6 = vcmp.gt.f32.partialorder %v1029_v23, 0.0 }
 0x3e0   :  { %1819 = vpow2.f32 %v1033_v25 }
 0x3e1   :  { %v1207_v26 = vpop.f32.mrb[4].mxu0 }
 0x3e2   :  { %v1673_v27 = vpop.f32.mrb[5].mxu0 }
 0x3ea   :  { %v1820_v28 = vpop.eup %1819 }
 0x3eb   :  { %v1420_v29 = vadd.f32 -1.0, %v1820_v28 }
 0x3ed   :  { %v1036_v30 = vsel %vm1032_vm6, %v1029_v23, %v1420_v29 }
 0x3ee   :  { %1663 = vmatmul.mubr.msk.f32.vlgmr.msra.gmra.mrb[8].mxu1 %vm1048_vm5, %v1036_v30 }
 0x3ef   :  { %1678 = vmatprep.mubr.msk.f32.mxu1 %vm1953_vm3, %v1952_v11  ;;  %1782 = vmatpush3.bf16.msra.mxu1 %v1781_v32 }
 0x4c1   :  { %v1118_v34 = vpop.f32.mrb[8].mxu1 }
 0x4c2   :  { %v1119_v35 = vadd.f32 %v1421_v33, %v1118_v34  ;;  %v1664_v36 = vpop.f32.mrb[9].mxu1 }
 0x4c4   :  { %v1123_v37 = vmul.f32 1.442695, %v1119_v35  ;;  %vm1122_vm3 = vcmp.gt.f32.partialorder %v1119_v35, 0.0 }
 0x4c6   :  { %1821 = vpow2.f32 %v1123_v37 }
 0x4d0   :  { %v1822_v11 = vpop.eup %1821 }
 0x4d1   :  { %v1423_v38 = vadd.f32 -1.0, %v1822_v11 }
 0x4d3   :  { %v1126_v39 = vmul.f32 1.6732632, %v1423_v38 }
 0x4d5   :  { %v1127_v40 = vsel %vm1122_vm3, %v1119_v35, %v1126_v39 }
 0x4d6   :  { %v1128_v41 = vmul.f32 1.050701, %v1127_v40 }
 0x4d8   :  { %1679 = vmatmul.mubr.msk.f32.vlgmr.msra.gmra.mrb[10].mxu1 %vm1211_vm7, %v1128_v41 }
 0x5ab   :  { %v1281_v43 = vpop.f32.mrb[10].mxu1 }
 0x5ac   :  { %v1282_v45 = vadd.f32 %v1281_v43, %v1207_v26  ;;  %v1680_v46 = vpop.f32.mrb[11].mxu1 }
 0x5ae   :  { %v1292_v47 = vadd.f32 %v1427_v44, %v1282_v45 }
 0x5b0   :  { %v1293_v48 = vmax.f32 %v1292_v47, 0.0 }
 0x5b2   :  { %1684 = vmatmul.mubr.msk.f32.vlgmr.msra.gmra.mrb[6].mxu0 %vm1302_vm9, %v1293_v48 }
 0x685   :  { %v1376_v50 = vpop.f32.mrb[6].mxu0 }
 0x686   :  { %v1377_v51 = vadd.f32 %v1428_v49, %v1376_v50  ;;  %v1685_v52 = vpop.f32.mrb[7].mxu0 }
 0x688   :  { %v1381_v53 = vmul.f32 1.442695, %v1377_v51  ;;  %vm1380_vm11 = vcmp.gt.f32.partialorder %v1377_v51, 0.0 }
 0x68a   :  { %1823 = vpow2.f32 %v1381_v53 }
 0x694   :  { %v1824_v54 = vpop.eup %1823 }
 0x695   :  { %v1431_v55 = vadd.f32 -1.0, %v1824_v54 }
 0x697   :  { %v1384_v56 = vsel %vm1380_vm11, %v1377_v51, %v1431_v55 }
 0x698   :  { %1386 = vst.msk [vmem:[%s2512_s20] sm:$0xff] %vm1385_vm10, %v1384_v56 }
 0x699   :  { %1391 = vsyncpa [#allocation4], 1 }
 0x69a   :  { %1392 = vsyncpa [#allocation6], 1 }
 0x69b   :  { %1393 = vsyncpa [#allocation9], 1 }

</bundles_post_ra>
